<compile_context>
chip_gen: v7x
topology: tpu7x:2x2x1
jax: 0.10.0
libtpu: 0.0.40
codegen_flags: <defaults>
</compile_context>

<pallas_src>
import functools

import jax
import jax.numpy as jnp
from jax.experimental import pallas as pl
from jax.experimental.pallas import tpu as pltpu


def _round_up(x, m):
    return ((x + m - 1) // m) * m


def _pad_cast_2d(a, rows, cols, dtype):
    """Zero-pad a (possibly smaller) 2-D array to (rows, cols) and cast."""
    r, c = a.shape
    if (r, c) == (rows, cols) and a.dtype == dtype:
        return a
    out = jnp.zeros((rows, cols), dtype)
    return out.at[:r, :c].set(a.astype(dtype))


def _mlp_forward_kernel(x_ref, w1_ref, b1_ref, w2_ref, b2_ref, o_ref):
    # Hidden layer: bf16 operands on the MXU, f32 accumulation.
    h = jnp.dot(x_ref[...], w1_ref[...], preferred_element_type=jnp.float32)
    h = jnp.maximum(h + b1_ref[...], 0.0)          # bias add + ReLU in f32

    # Output layer.
    o = jnp.dot(h.astype(jnp.bfloat16), w2_ref[...],
                preferred_element_type=jnp.float32)
    o_ref[...] = (o + b2_ref[...]).astype(o_ref.dtype)


@functools.partial(jax.jit, static_argnames=("tile_m",))
def net_forward(features, w1, b1, w2, b2, *, tile_m=512):
    """Forward pass of NET: output = backbone_MLP(features)."""
    n, f_in = features.shape
    hidden = w1.shape[1]
    n_out = w2.shape[1]

    # Lane-dense (multiple-of-128) padded widths for feature / hidden / class dims.
    f_pad = _round_up(f_in, 128)
    h_pad = _round_up(hidden, 128)
    c_pad = _round_up(n_out, 128)

    # Row tile: multiple of 8 sublanes; pad rows up to a multiple of the tile so
    # every grid step sees a full, aligned block (no masked remainder tile).
    tile_m = max(8, min(_round_up(tile_m, 8), _round_up(n, 8)))
    n_pad = _round_up(n, tile_m)

    # Pad + cast once in the wrapper (the pad already materializes a copy, so
    # the bf16 cast here is free and halves kernel HBM traffic for x / weights).
    x_p = _pad_cast_2d(features, n_pad, f_pad, jnp.bfloat16)
    w1_p = _pad_cast_2d(w1, f_pad, h_pad, jnp.bfloat16)
    w2_p = _pad_cast_2d(w2, h_pad, c_pad, jnp.bfloat16)
    b1_p = _pad_cast_2d(b1.reshape(1, -1), 1, h_pad, jnp.float32)
    b2_p = _pad_cast_2d(b2.reshape(1, -1), 1, c_pad, jnp.float32)

    grid = (n_pad // tile_m,)

    # VMEM budget: double-buffered tiles + resident weights + f32 intermediates.
    vmem_bytes = (
        2 * tile_m * f_pad * 2            # pipelined bf16 input row tiles
        + 2 * tile_m * c_pad * 4          # pipelined f32 output row tiles
        + 2 * (f_pad * h_pad + h_pad * c_pad) * 2   # resident bf16 weights
        + 2 * (h_pad + c_pad) * 4                   # resident f32 biases
        + tile_m * h_pad * (4 + 2)        # hidden activations (f32 + bf16 copy)
    )
    vmem_limit = int(min(max(2 * vmem_bytes, 32 * 1024 * 1024), 56 * 1024 * 1024))

    cost = pl.CostEstimate(
        flops=2 * n_pad * (f_pad * h_pad + h_pad * c_pad),
        transcendentals=0,
        bytes_accessed=(2 * (n_pad * f_pad + f_pad * h_pad + h_pad * c_pad)
                        + 4 * n_pad * c_pad),
    )

    out_p = pl.pallas_call(
        _mlp_forward_kernel,
        out_shape=jax.ShapeDtypeStruct((n_pad, c_pad), jnp.float32),
        grid=grid,
        in_specs=[
            pl.BlockSpec((tile_m, f_pad), lambda i: (i, 0)),   # x: tiles over rows
            pl.BlockSpec((f_pad, h_pad), lambda i: (0, 0)),    # W1: VMEM-resident
            pl.BlockSpec((1, h_pad), lambda i: (0, 0)),        # b1: VMEM-resident
            pl.BlockSpec((h_pad, c_pad), lambda i: (0, 0)),    # W2: VMEM-resident
            pl.BlockSpec((1, c_pad), lambda i: (0, 0)),        # b2: VMEM-resident
        ],
        out_specs=pl.BlockSpec((tile_m, c_pad), lambda i: (i, 0)),
        compiler_params=pltpu.CompilerParams(
            dimension_semantics=("parallel",),
            vmem_limit_bytes=vmem_limit,
        ),
        cost_estimate=cost,
    )(x_p, w1_p, b1_p, w2_p, b2_p)

    # Strip row and class padding back off.
    return out_p[:n, :n_out]


def reference_forward(features, w1, b1, w2, b2):
    # Same bf16-operand / f32-accumulate recipe as the kernel.
    h = jnp.dot(features.astype(jnp.bfloat16), w1.astype(jnp.bfloat16),
                preferred_element_type=jnp.float32) + b1
    h = jnp.maximum(h, 0.0)
    o = jnp.dot(h.astype(jnp.bfloat16), w2.astype(jnp.bfloat16),
                preferred_element_type=jnp.float32) + b2
    return o


if __name__ == "__main__":
    # Small shapes consistent with a node-feature MLP backbone.
    # num_nodes deliberately NOT a multiple of the test tile to exercise padding.
    num_nodes, in_feats, hidden, n_classes = 20, 32, 64, 16

    key = jax.random.PRNGKey(0)
    k_x, k_w1, k_b1, k_w2, k_b2 = jax.random.split(key, 5)

    features = jax.random.normal(k_x, (num_nodes, in_feats), dtype=jnp.float32)
    w1 = jax.random.normal(k_w1, (in_feats, hidden), dtype=jnp.float32) * 0.1
    b1 = jax.random.normal(k_b1, (hidden,), dtype=jnp.float32) * 0.1
    w2 = jax.random.normal(k_w2, (hidden, n_classes), dtype=jnp.float32) * 0.1
    b2 = jax.random.normal(k_b2, (n_classes,), dtype=jnp.float32) * 0.1

    ref = reference_forward(features, w1, b1, w2, b2)

    # Default (single-tile) path.
    out_default = jax.block_until_ready(net_forward(features, w1, b1, w2, b2))
    # Multi-tile path (tile_m=8 -> grid of 3 row tiles, exercises pipelining).
    out_tiled = jax.block_until_ready(
        net_forward(features, w1, b1, w2, b2, tile_m=8))

    assert out_default.shape == (num_nodes, n_classes)
    assert out_tiled.shape == (num_nodes, n_classes)
    assert jnp.allclose(out_default, ref, atol=1e-3, rtol=1e-3)
    assert jnp.allclose(out_tiled, ref, atol=1e-3, rtol=1e-3)

    print("KERNEL_OK")
</pallas_src>

<mosaic_0001>
module attributes {stable_mosaic.version = 11 : i64} {
  func.func @_mlp_forward_kernel(%arg0: i32, %arg1: memref<24x128xbf16, #tpu.memory_space<vmem>>, %arg2: memref<128x128xbf16, #tpu.memory_space<vmem>>, %arg3: memref<1x128xf32, #tpu.memory_space<vmem>>, %arg4: memref<128x128xbf16, #tpu.memory_space<vmem>>, %arg5: memref<1x128xf32, #tpu.memory_space<vmem>>, %arg6: memref<24x128xf32, #tpu.memory_space<vmem>>) attributes {dimension_semantics = [#tpu.dimension_semantics<parallel>], iteration_bounds = array<i64: 1>, scalar_prefetch = 0 : i64, scratch_operands = 0 : i64, tpu.core_type = #tpu.core_type<tc>, window_params = [{transform_indices = @transform_0, window_bounds = array<i64: 24, 128>}, {pipeline_mode = #tpu.pipeline_mode<synchronous>, transform_indices = @transform_1, window_bounds = array<i64: 128, 128>}, {pipeline_mode = #tpu.pipeline_mode<synchronous>, transform_indices = @transform_2, window_bounds = array<i64: 1, 128>}, {pipeline_mode = #tpu.pipeline_mode<synchronous>, transform_indices = @transform_3, window_bounds = array<i64: 128, 128>}, {pipeline_mode = #tpu.pipeline_mode<synchronous>, transform_indices = @transform_4, window_bounds = array<i64: 1, 128>}, {transform_indices = @transform_5, window_bounds = array<i64: 24, 128>}]} {
    %c0 = arith.constant 0 : index
    %c0_0 = arith.constant 0 : index
    %0 = vector.load %arg1[%c0, %c0_0] : memref<24x128xbf16, #tpu.memory_space<vmem>>, vector<24x128xbf16>
    %c0_1 = arith.constant 0 : index
    %c0_2 = arith.constant 0 : index
    %1 = vector.load %arg2[%c0_1, %c0_2] : memref<128x128xbf16, #tpu.memory_space<vmem>>, vector<128x128xbf16>
    %cst = arith.constant dense<0.000000e+00> : vector<24x128xf32>
    %2 = tpu.matmul %0, %1, %cst {dimension_numbers = #tpu.dot_dimension_numbers<[1], [0], [0], [1], [0, 0, 1, 1], [], []>} : vector<24x128xbf16>, vector<128x128xbf16>, vector<24x128xf32> -> vector<24x128xf32>
    %c0_3 = arith.constant 0 : index
    %c0_4 = arith.constant 0 : index
    %3 = vector.load %arg3[%c0_3, %c0_4] : memref<1x128xf32, #tpu.memory_space<vmem>>, vector<1x128xf32>
    %4 = vector.broadcast %3 : vector<1x128xf32> to vector<24x128xf32>
    %5 = arith.addf %2, %4 : vector<24x128xf32>
    %cst_5 = arith.constant 0.000000e+00 : f32
    %6 = vector.broadcast %cst_5 : f32 to vector<24x128xf32>
    %7 = arith.maximumf %5, %6 : vector<24x128xf32>
    %8 = arith.truncf %7 : vector<24x128xf32> to vector<24x128xbf16>
    %c0_6 = arith.constant 0 : index
    %c0_7 = arith.constant 0 : index
    %9 = vector.load %arg4[%c0_6, %c0_7] : memref<128x128xbf16, #tpu.memory_space<vmem>>, vector<128x128xbf16>
    %cst_8 = arith.constant dense<0.000000e+00> : vector<24x128xf32>
    %10 = tpu.matmul %8, %9, %cst_8 {dimension_numbers = #tpu.dot_dimension_numbers<[1], [0], [0], [1], [0, 0, 1, 1], [], []>} : vector<24x128xbf16>, vector<128x128xbf16>, vector<24x128xf32> -> vector<24x128xf32>
    %c0_9 = arith.constant 0 : index
    %c0_10 = arith.constant 0 : index
    %11 = vector.load %arg5[%c0_9, %c0_10] : memref<1x128xf32, #tpu.memory_space<vmem>>, vector<1x128xf32>
    %12 = vector.broadcast %11 : vector<1x128xf32> to vector<24x128xf32>
    %13 = arith.addf %10, %12 : vector<24x128xf32>
    %c0_11 = arith.constant 0 : index
    %c0_12 = arith.constant 0 : index
    %14 = vector.load %arg6[%c0_11, %c0_12] : memref<24x128xf32, #tpu.memory_space<vmem>>, vector<24x128xf32>
    tpu.vector_store %arg6[%c0_11, %c0_12], %13 {strides = array<i32>} : memref<24x128xf32, #tpu.memory_space<vmem>>, vector<24x128xf32>,
    return
  }
  func.func @transform_0(%arg0: i32) -> (i32, i32) {
    %c0_i32 = arith.constant 0 : i32
    %c0_i32_0 = arith.constant 0 : i32
    return %arg0, %c0_i32 : i32, i32
  }
  func.func @transform_1(%arg0: i32) -> (i32, i32) {
    %c0_i32 = arith.constant 0 : i32
    %c0_i32_0 = arith.constant 0 : i32
    %c0_i32_1 = arith.constant 0 : i32
    return %c0_i32, %c0_i32_0 : i32, i32
  }
  func.func @transform_2(%arg0: i32) -> (i32, i32) {
    %c0_i32 = arith.constant 0 : i32
    %c0_i32_0 = arith.constant 0 : i32
    %c0_i32_1 = arith.constant 0 : i32
    return %c0_i32, %c0_i32_0 : i32, i32
  }
  func.func @transform_3(%arg0: i32) -> (i32, i32) {
    %c0_i32 = arith.constant 0 : i32
    %c0_i32_0 = arith.constant 0 : i32
    %c0_i32_1 = arith.constant 0 : i32
    return %c0_i32, %c0_i32_0 : i32, i32
  }
  func.func @transform_4(%arg0: i32) -> (i32, i32) {
    %c0_i32 = arith.constant 0 : i32
    %c0_i32_0 = arith.constant 0 : i32
    %c0_i32_1 = arith.constant 0 : i32
    return %c0_i32, %c0_i32_0 : i32, i32
  }
  func.func @transform_5(%arg0: i32) -> (i32, i32) {
    %c0_i32 = arith.constant 0 : i32
    %c0_i32_0 = arith.constant 0 : i32
    return %arg0, %c0_i32 : i32, i32
  }
}

</mosaic_0001>

<bundles_post_ra>
// kernel: net_forward.1
= control target key start
LH: loop header
LB: loop body
LE: loop exit
PB: predicated region body
PF: predicated region fallthrough
CT: control target
= control target key end

     0   :  { %s481_s1 = inlined_call_operand.vmem [shape: bf16[128,128], index: 1, kind: input, shape index: {}]   ;;  %s482_s0 = inlined_call_operand.vmem [shape: bf16[24,128], index: 0, kind: input, shape index: {}]   ;;  %s483_s3 = inlined_call_operand.vmem [shape: bf16[128,128], index: 3, kind: input, shape index: {}]   ;;  %s484_s2 = inlined_call_operand.vmem [shape: f32[1,128], index: 2, kind: input, shape index: {}]   ;;  %s485_s4 = inlined_call_operand.vmem [shape: f32[1,128], index: 4, kind: input, shape index: {}]   ;;  %s486_s5 = inlined_call_operand.vmem [shape: f32[24,128], index: 5, kind: output, shape index: {}]  }
   0x1   :  { %v364_v0 = vld [vmem:[%s481_s1] sm:$0xff]   ;;  %v365_v1 = vld [vmem:[%s481_s1 + $0x8] sm:$0xff]   ;;  %v366_v2 = vld [vmem:[%s481_s1 + $0x10] sm:$0xff]  }
   0x2   :  { %324 = vmatprep.subr.bf16.mxu0 %v364_v0  ;;  %v367_v3 = vld [vmem:[%s481_s1 + $0x18] sm:$0xff]   ;;  %v372_v4 = vld [vmem:[%s482_s0] sm:$0xff]   ;;  %v375_v6 = vld [vmem:[%s483_s3 + $0x8] sm:$0xff]  }
   0x3   :  { %325 = vmatpush3.bf16.msra.mxu0 %v364_v0  ;;  %340 = vmatprep.mubr.bf16.mxu0 %v372_v4  ;;  %v374_v5 = vld [vmem:[%s483_s3] sm:$0xff]   ;;  %v376_v8 = vld [vmem:[%s483_s3 + $0x10] sm:$0xff]   ;;  %v369_v9 = vld [vmem:[%s481_s1 + $0x28] sm:$0xff]  }
   0x4   :  { %326 = vmatprep.subr.bf16.mxu0 %v365_v1  ;;  %v368_v7 = vld [vmem:[%s481_s1 + $0x20] sm:$0xff]   ;;  %344 = vmatprep.subr.bf16.mxu1 %v374_v5  ;;  %v377_v10 = vld [vmem:[%s483_s3 + $0x18] sm:$0xff]   ;;  %v370_v11 = vld [vmem:[%s481_s1 + $0x30] sm:$0xff]  }
   0x5   :  { %345 = vmatpush3.bf16.msra.mxu1 %v374_v5  ;;  %v378_v12 = vld [vmem:[%s483_s3 + $0x20] sm:$0xff]   ;;  %v371_v13 = vld [vmem:[%s481_s1 + $0x38] sm:$0xff]   ;;  %v379_v14 = vld [vmem:[%s483_s3 + $0x28] sm:$0xff]  }
   0x6   :  { %346 = vmatprep.subr.bf16.mxu1 %v375_v6  ;;  %v373_v15 = vld [vmem:[%s482_s0 + $0x8] ss:$0 sps:$4 sm:$0xff]   ;;  %v380_v16 = vld [vmem:[%s483_s3 + $0x30] sm:$0xff]   ;;  %v381_v17 = vld [vmem:[%s483_s3 + $0x38] sm:$0xff]  }
   0x7   :  { %327 = vmatpush3.bf16.msra.mxu0 %v365_v1  ;;  %v284_v18 = vld [vmem:[%s484_s2] ss:$0 sm:$0xff] }
   0x8   :  { %328 = vmatprep.subr.bf16.mxu0 %v366_v2  ;;  %v295_v31 = vld [vmem:[%s485_s4] ss:$0 sm:$0xff] }
   0x9   :  { %347 = vmatpush3.bf16.msra.mxu1 %v375_v6 }
   0xa   :  { %348 = vmatprep.subr.bf16.mxu1 %v376_v8 }
   0xb   :  { %329 = vmatpush3.bf16.msra.mxu0 %v366_v2 }
   0xc   :  { %330 = vmatprep.subr.bf16.mxu0 %v367_v3 }
   0xd   :  { %349 = vmatpush3.bf16.msra.mxu1 %v376_v8 }
   0xe   :  { %350 = vmatprep.subr.bf16.mxu1 %v377_v10 }
   0xf   :  { %331 = vmatpush3.bf16.msra.mxu0 %v367_v3 }
  0x10   :  { %332 = vmatprep.subr.bf16.mxu0 %v368_v7 }
  0x11   :  { %351 = vmatpush3.bf16.msra.mxu1 %v377_v10 }
  0x12   :  { %352 = vmatprep.subr.bf16.mxu1 %v378_v12 }
  0x13   :  { %333 = vmatpush3.bf16.msra.mxu0 %v368_v7 }
  0x14   :  { %334 = vmatprep.subr.bf16.mxu0 %v369_v9 }
  0x15   :  { %353 = vmatpush3.bf16.msra.mxu1 %v378_v12 }
  0x16   :  { %354 = vmatprep.subr.bf16.mxu1 %v379_v14 }
  0x17   :  { %335 = vmatpush3.bf16.msra.mxu0 %v369_v9 }
  0x18   :  { %336 = vmatprep.subr.bf16.mxu0 %v370_v11 }
  0x19   :  { %355 = vmatpush3.bf16.msra.mxu1 %v379_v14 }
  0x1a   :  { %356 = vmatprep.subr.bf16.mxu1 %v380_v16 }
  0x1b   :  { %337 = vmatpush3.bf16.msra.mxu0 %v370_v11 }
  0x1c   :  { %338 = vmatprep.subr.bf16.mxu0 %v371_v13 }
  0x1d   :  { %357 = vmatpush3.bf16.msra.mxu1 %v380_v16 }
  0x1e   :  { %358 = vmatprep.subr.bf16.mxu1 %v381_v17 }
  0x1f   :  { %339 = vmatpush3.bf16.msra.mxu0 %v371_v13 }
  0x21   :  { %359 = vmatpush3.bf16.msra.mxu1 %v381_v17 }
  0x22   :  { %341 = vmatmul.mubr.bf16.vlgmr.msra.gmra.mrb[0].mxu0 %v373_v15 }
  0xf5   :  { %v342_v19 = vpop.f32.mrb[0].mxu0 }
  0xf6   :  { %v148_v20 = vadd.f32 %v342_v19, %v284_v18  ;;  %v139_v21 = vpop.f32.mrb[1].mxu0 }
  0xf7   :  { %v140_v22 = vadd.f32 %v284_v18, %v139_v21  ;;  %v343_v23 = vpop.f32.mrb[2].mxu0 }
  0xf8   :  { %v142_v24 = vpop.f32.mrb[3].mxu0  ;;  %v155_v26 = vmax.f32 %v148_v20, 0.0 }
  0xf9   :  { %v143_v25 = vadd.f32 %v284_v18, %v142_v24  ;;  %v153_v27 = vmax.f32 %v140_v22, 0.0 }
  0xfa   :  { %v157_v30 = vpack.c.bf16 %v155_v26, %v155_v26 }
  0xfb   :  { %v154_v28 = vmax.f32 %v143_v25, 0.0 }
  0xfd   :  { %v156_v29 = vpack.c.bf16 %v154_v28, %v153_v27 }
  0xff   :  { %360 = vmatprep.mubr.bf16.mxu1 %v156_v29 }
 0x100   :  { %361 = vmatmul.mubr.bf16.vlgmr.msra.gmra.mrb[0].mxu1 %v157_v30 }
 0x1d3   :  { %v362_v32 = vpop.f32.mrb[0].mxu1 }
 0x1d4   :  { %v272_v33 = vadd.f32 %v362_v32, %v295_v31  ;;  %v263_v34 = vpop.f32.mrb[1].mxu1 }
 0x1d5   :  { %v264_v35 = vadd.f32 %v295_v31, %v263_v34  ;;  %v363_v36 = vpop.f32.mrb[2].mxu1 }
 0x1d6   :  { %279 = vst [vmem:[%s486_s5 + $0x10] sm:$0xff] %v272_v33  ;;  %v266_v37 = vpop.f32.mrb[3].mxu1 }
 0x1d7   :  { %277 = vst [vmem:[%s486_s5] sm:$0xff] %v264_v35  ;;  %v267_v38 = vadd.f32 %v295_v31, %v266_v37 }
 0x1d9   :  { %278 = vst [vmem:[%s486_s5 + $0x8] sm:$0xff] %v267_v38 }

</bundles_post_ra>
